<compile_context>
chip_gen: v7x
topology: tpu7x:2x2x1
jax: 0.10.0
libtpu: 0.0.40
codegen_flags: <defaults>
</compile_context>

<pallas_src>
import jax
import jax.numpy as jnp
from jax.experimental import pallas as pl
from jax.experimental.pallas import tpu as pltpu

EPS = 1e-6


def _round_up(n, m):
    return ((n + m - 1) // m) * m


def sublayer_connection_kernel(x_ref, a2_ref, b2_ref, w_ref, bw_ref, o_ref):
    """One (TM, H) row tile: LayerNorm -> Linear (bf16 MXU, f32 acc) -> residual add."""
    x = x_ref[...].astype(jnp.float32)
    H = x.shape[-1]

    # --- LayerNorm (PyTorch semantics: unbiased std, eps added to std, f32 stats) ---
    mean = jnp.mean(x, axis=-1, keepdims=True)
    diff = x - mean
    var_unbiased = jnp.sum(diff * diff, axis=-1, keepdims=True) / (H - 1)
    std = jnp.sqrt(var_unbiased)
    # Per-row reciprocal on the EUP slot instead of a full-tile VALU divide.
    inv_std = pl.reciprocal(std + EPS, approx=True)
    # Fold a_2 into the inverse-std scale: a single broadcast multiply over the tile.
    scale = a2_ref[...].astype(jnp.float32) * inv_std
    normed = diff * scale + b2_ref[...].astype(jnp.float32)

    # --- sublayer: Linear(H -> H) on the MXU, bf16 operands / f32 accumulate ---
    y = jnp.dot(normed.astype(jnp.bfloat16), w_ref[...],
                preferred_element_type=jnp.float32)

    # --- dropout (identity, eval mode) + bias + residual, in f32 ---
    # TODO(synk): training-mode dropout would use pltpu.prng_seed / prng_random_bits.
    o_ref[...] = (x + y + bw_ref[...].astype(jnp.float32)).astype(o_ref.dtype)


def sublayer_connection(x, a2, b2, w, bw, *, tile_rows=256):
    """x: (B, S, H).  a2, b2: (H,).  w: (H, H).  bw: (H,)."""
    B, S, H = x.shape
    rows = B * S

    # Pack-aligned row tile (multiple of 16 also covers bf16 sublane packing),
    # clamped so tiny inputs don't over-pad; rows padded so any (B, S) works.
    tm = max(16, min(_round_up(tile_rows, 16), _round_up(rows, 16)))
    padded_rows = _round_up(rows, tm)

    x2 = x.reshape(rows, H)
    if padded_rows != rows:
        x2 = jnp.pad(x2, ((0, padded_rows - rows), (0, 0)))

    a2_2d = a2.reshape(1, H).astype(jnp.float32)
    b2_2d = b2.reshape(1, H).astype(jnp.float32)
    bw_2d = bw.reshape(1, H).astype(jnp.float32)
    # Resident weight in bf16: native MXU dtype, half the VMEM footprint.
    w_bf16 = w.astype(jnp.bfloat16)
    # TODO(synk): for very large H (>= ~3072 on v7x's 64 MiB VMEM) tile the weight over an
    # extra N (and K) grid axis instead of holding the full (H, H) block resident.

    grid = (padded_rows // tm,)

    out = pl.pallas_call(
        sublayer_connection_kernel,
        out_shape=jax.ShapeDtypeStruct((padded_rows, H), x.dtype),
        grid_spec=pltpu.PrefetchScalarGridSpec(
            num_scalar_prefetch=0,
            grid=grid,
            in_specs=[
                pl.BlockSpec((tm, H), lambda i: (i, 0)),   # x row tile (pipelined)
                pl.BlockSpec((1, H), lambda i: (0, 0)),    # a_2 (resident)
                pl.BlockSpec((1, H), lambda i: (0, 0)),    # b_2 (resident)
                pl.BlockSpec((H, H), lambda i: (0, 0)),    # sublayer weight (bf16, resident)
                pl.BlockSpec((1, H), lambda i: (0, 0)),    # sublayer bias (resident)
            ],
            out_specs=pl.BlockSpec((tm, H), lambda i: (i, 0)),
        ),
        compiler_params=pltpu.CompilerParams(
            dimension_semantics=("parallel",),   # shards row tiles across TCs on v7x
            vmem_limit_bytes=48 * 1024 * 1024,
        ),
    )(x2, a2_2d, b2_2d, w_bf16, bw_2d)

    return out[:rows].reshape(B, S, H)


def reference(x, a2, b2, w, bw):
    # Pure-JAX reference with PyTorch semantics (full f32, exact divide).
    xf = x.astype(jnp.float32)
    mean = jnp.mean(xf, axis=-1, keepdims=True)
    diff = xf - mean
    var_unbiased = jnp.sum(diff * diff, axis=-1, keepdims=True) / (xf.shape[-1] - 1)
    std = jnp.sqrt(var_unbiased)
    normed = a2 * diff / (std + EPS) + b2
    y = normed @ w + bw
    return (xf + y).astype(x.dtype)


if __name__ == "__main__":
    B, S, H = 2, 8, 32  # size = hidden = 32

    key = jax.random.PRNGKey(0)
    kx, kw, kb = jax.random.split(key, 3)

    x = jax.random.normal(kx, (B, S, H), dtype=jnp.float32)

    # LayerNorm params: ones / zeros exactly as in __init__.
    a2 = jnp.ones((H,), dtype=jnp.float32)
    b2 = jnp.zeros((H,), dtype=jnp.float32)

    # Deterministic synthetic sublayer (Linear H->H).
    w = jax.random.normal(kw, (H, H), dtype=jnp.float32) * 0.05
    bw = jax.random.normal(kb, (H,), dtype=jnp.float32) * 0.05

    out = sublayer_connection(x, a2, b2, w, bw)
    out = jax.block_until_ready(out)

    ref = reference(x, a2, b2, w, bw)
    # bf16 MXU operands + approx EUP reciprocal => slightly looser than the pure-f32 ref.
    assert jnp.allclose(out, ref, atol=1e-2, rtol=1e-2), "mismatch vs reference"

    print("KERNEL_OK")
</pallas_src>

<mosaic_0001>
module attributes {stable_mosaic.version = 11 : i64} {
  func.func @sublayer_connection_kernel(%arg0: i32, %arg1: memref<16x32xf32, #tpu.memory_space<vmem>>, %arg2: memref<1x32xf32, #tpu.memory_space<vmem>>, %arg3: memref<1x32xf32, #tpu.memory_space<vmem>>, %arg4: memref<32x32xbf16, #tpu.memory_space<vmem>>, %arg5: memref<1x32xf32, #tpu.memory_space<vmem>>, %arg6: memref<16x32xf32, #tpu.memory_space<vmem>>) attributes {dimension_semantics = [#tpu.dimension_semantics<parallel>], iteration_bounds = array<i64: 1>, scalar_prefetch = 0 : i64, scratch_operands = 0 : i64, tpu.core_type = #tpu.core_type<tc>, window_params = [{transform_indices = @transform_0, window_bounds = array<i64: 16, 32>}, {pipeline_mode = #tpu.pipeline_mode<synchronous>, transform_indices = @transform_1, window_bounds = array<i64: 1, 32>}, {pipeline_mode = #tpu.pipeline_mode<synchronous>, transform_indices = @transform_2, window_bounds = array<i64: 1, 32>}, {pipeline_mode = #tpu.pipeline_mode<synchronous>, transform_indices = @transform_3, window_bounds = array<i64: 32, 32>}, {pipeline_mode = #tpu.pipeline_mode<synchronous>, transform_indices = @transform_4, window_bounds = array<i64: 1, 32>}, {transform_indices = @transform_5, window_bounds = array<i64: 16, 32>}]} {
    %c0 = arith.constant 0 : index
    %c0_0 = arith.constant 0 : index
    %0 = vector.load %arg1[%c0, %c0_0] : memref<16x32xf32, #tpu.memory_space<vmem>>, vector<16x32xf32>
    %cst = arith.constant dense<0.000000e+00> : vector<16xf32>
    %1 = vector.multi_reduction <add>, %0, %cst [1] : vector<16x32xf32> to vector<16xf32>
    %2 = vector.shape_cast %1 : vector<16xf32> to vector<16x1xf32>
    %cst_1 = arith.constant 3.200000e+01 : f32
    %3 = vector.broadcast %cst_1 : f32 to vector<16x1xf32>
    %4 = arith.divf %2, %3 : vector<16x1xf32>
    %5 = vector.broadcast %4 : vector<16x1xf32> to vector<16x32xf32>
    %6 = arith.subf %0, %5 : vector<16x32xf32>
    %7 = arith.mulf %6, %6 : vector<16x32xf32>
    %cst_2 = arith.constant dense<0.000000e+00> : vector<16xf32>
    %8 = vector.multi_reduction <add>, %7, %cst_2 [1] : vector<16x32xf32> to vector<16xf32>
    %9 = vector.shape_cast %8 : vector<16xf32> to vector<16x1xf32>
    %cst_3 = arith.constant 3.100000e+01 : f32
    %10 = vector.broadcast %cst_3 : f32 to vector<16x1xf32>
    %11 = arith.divf %9, %10 : vector<16x1xf32>
    %12 = math.sqrt %11 : vector<16x1xf32>
    %cst_4 = arith.constant 9.99999997E-7 : f32
    %13 = vector.broadcast %cst_4 : f32 to vector<16x1xf32>
    %14 = arith.addf %12, %13 : vector<16x1xf32>
    %15 = tpu.reciprocal %14 {approx = true} : vector<16x1xf32> -> vector<16x1xf32>
    %c0_5 = arith.constant 0 : index
    %c0_6 = arith.constant 0 : index
    %16 = vector.load %arg2[%c0_5, %c0_6] : memref<1x32xf32, #tpu.memory_space<vmem>>, vector<1x32xf32>
    %17 = vector.broadcast %16 : vector<1x32xf32> to vector<16x32xf32>
    %18 = vector.broadcast %15 : vector<16x1xf32> to vector<16x32xf32>
    %19 = arith.mulf %17, %18 : vector<16x32xf32>
    %20 = arith.mulf %6, %19 : vector<16x32xf32>
    %c0_7 = arith.constant 0 : index
    %c0_8 = arith.constant 0 : index
    %21 = vector.load %arg3[%c0_7, %c0_8] : memref<1x32xf32, #tpu.memory_space<vmem>>, vector<1x32xf32>
    %22 = vector.broadcast %21 : vector<1x32xf32> to vector<16x32xf32>
    %23 = arith.addf %20, %22 : vector<16x32xf32>
    %24 = arith.truncf %23 : vector<16x32xf32> to vector<16x32xbf16>
    %c0_9 = arith.constant 0 : index
    %c0_10 = arith.constant 0 : index
    %25 = vector.load %arg4[%c0_9, %c0_10] : memref<32x32xbf16, #tpu.memory_space<vmem>>, vector<32x32xbf16>
    %cst_11 = arith.constant dense<0.000000e+00> : vector<16x32xf32>
    %26 = tpu.matmul %24, %25, %cst_11 {dimension_numbers = #tpu.dot_dimension_numbers<[1], [0], [0], [1], [0, 0, 1, 1], [], []>} : vector<16x32xbf16>, vector<32x32xbf16>, vector<16x32xf32> -> vector<16x32xf32>
    %27 = arith.addf %0, %26 : vector<16x32xf32>
    %c0_12 = arith.constant 0 : index
    %c0_13 = arith.constant 0 : index
    %28 = vector.load %arg5[%c0_12, %c0_13] : memref<1x32xf32, #tpu.memory_space<vmem>>, vector<1x32xf32>
    %29 = vector.broadcast %28 : vector<1x32xf32> to vector<16x32xf32>
    %30 = arith.addf %27, %29 : vector<16x32xf32>
    %c0_14 = arith.constant 0 : index
    %c0_15 = arith.constant 0 : index
    %31 = vector.load %arg6[%c0_14, %c0_15] : memref<16x32xf32, #tpu.memory_space<vmem>>, vector<16x32xf32>
    tpu.vector_store %arg6[%c0_14, %c0_15], %30 {strides = array<i32>} : memref<16x32xf32, #tpu.memory_space<vmem>>, vector<16x32xf32>,
    return
  }
  func.func @transform_0(%arg0: i32) -> (i32, i32) {
    %c0_i32 = arith.constant 0 : i32
    %c0_i32_0 = arith.constant 0 : i32
    return %arg0, %c0_i32 : i32, i32
  }
  func.func @transform_1(%arg0: i32) -> (i32, i32) {
    %c0_i32 = arith.constant 0 : i32
    %c0_i32_0 = arith.constant 0 : i32
    %c0_i32_1 = arith.constant 0 : i32
    return %c0_i32, %c0_i32_0 : i32, i32
  }
  func.func @transform_2(%arg0: i32) -> (i32, i32) {
    %c0_i32 = arith.constant 0 : i32
    %c0_i32_0 = arith.constant 0 : i32
    %c0_i32_1 = arith.constant 0 : i32
    return %c0_i32, %c0_i32_0 : i32, i32
  }
  func.func @transform_3(%arg0: i32) -> (i32, i32) {
    %c0_i32 = arith.constant 0 : i32
    %c0_i32_0 = arith.constant 0 : i32
    %c0_i32_1 = arith.constant 0 : i32
    return %c0_i32, %c0_i32_0 : i32, i32
  }
  func.func @transform_4(%arg0: i32) -> (i32, i32) {
    %c0_i32 = arith.constant 0 : i32
    %c0_i32_0 = arith.constant 0 : i32
    %c0_i32_1 = arith.constant 0 : i32
    return %c0_i32, %c0_i32_0 : i32, i32
  }
  func.func @transform_5(%arg0: i32) -> (i32, i32) {
    %c0_i32 = arith.constant 0 : i32
    %c0_i32_0 = arith.constant 0 : i32
    return %arg0, %c0_i32 : i32, i32
  }
}

</mosaic_0001>

<bundles_post_ra>
// kernel: tpu_custom_call.1
= control target key start
LH: loop header
LB: loop body
LE: loop exit
PB: predicated region body
PF: predicated region fallthrough
CT: control target
= control target key end

     0   :  { %10 = vsyncpa [#allocation3], 0  ;;  %s420_s0 = inlined_call_operand.hbm [shape: f32[16,32], index: 0, kind: input, shape index: {}]   ;;  %s421_s1 = inlined_call_operand.vmem [shape: f32[1,32], index: 1, kind: input, shape index: {}]   ;;  %s422_s2 = inlined_call_operand.vmem [shape: f32[1,32], index: 2, kind: input, shape index: {}]   ;;  %s423_s3 = inlined_call_operand.hbm [shape: bf16[32,32], index: 3, kind: input, shape index: {}]   ;;  %s424_s4 = inlined_call_operand.vmem [shape: f32[1,32], index: 4, kind: input, shape index: {}]   ;;  %s425_s5 = inlined_call_operand.hbm [shape: f32[16,32], index: 5, kind: output, shape index: {}]  }
   0x1   :  { %11 = vsyncpa [#allocation6], 0 }
   0x2   :  { %12 = vsyncpa [#allocation4], 0  ;;  %s313_s18 = smov [#allocation2]   ;;  %s241_s22 = scalar_lea.hbm %s420_s0, 256 }
   0x3   :  { %s18_s19 = sshll.u32 %s313_s18, 4  ;;  %p242_p0 = scmp.ne.s32.totalorder %s420_s0, %s241_s22  ;;  %s19_s19 = int_to_ptr.vmem [resolvable:$true] %s18_s19 }
   0x4   :  { %p245_p1 = scmp.lt.u32.totalorder %s241_s22, %s420_s0 }
   0x6   :  { %p247_p2 = pnand %p245_p1, %p242_p0 }
   0x8   :  { %250 = shalt.err (!%p247_p2)
}
   0x9   :  { %s251_s27 = scalar_lea.vmem %s19_s19, 256  ;;  %p256_p4 = scmp.lt.s32.totalorder %s19_s19, %s19_s19 }
   0xa   :  { %p252_p3 = scmp.ne.s32.totalorder %s19_s19, %s251_s27  ;;  %p257_p5 = scmp.lt.s32.totalorder %s251_s27, %s251_s27 }
   0xc   :  { %p258_p6 = por %p257_p5, %p256_p4 }
   0xe   :  { %p259_p7 = pnand %p258_p6, %p252_p3 }
  0x10   :  { %262 = shalt.err (!%p259_p7)
}
  0x11   :  { %s314_s28 = smov 128   ;;  %s315_s29 = smov 8  }
  0x12   :  { %24 = dma.hbm_to_vmem [thread:$0]  %s420_s0, 256, %s19_s19, [#allocation3], %s314_s28, %s314_s28, %s315_s29  }
  0x13   :  { %s316_s7 = smov [#allocation5]   ;;  %s263_s11 = scalar_lea.hbm %s423_s3, 256 }
  0x14   :  { %s34_s8 = sshll.u32 %s316_s7, 4  ;;  %p264_p8 = scmp.ne.s32.totalorder %s423_s3, %s263_s11  ;;  %s35_s8 = int_to_ptr.vmem [resolvable:$true] %s34_s8 }
  0x15   :  { %p267_p9 = scmp.lt.u32.totalorder %s263_s11, %s423_s3 }
  0x17   :  { %p269_p10 = pnand %p267_p9, %p264_p8 }
  0x19   :  { %272 = shalt.err (!%p269_p10)
}
  0x1a   :  { %s273_s16 = scalar_lea.vmem %s35_s8, 256  ;;  %p278_p12 = scmp.lt.s32.totalorder %s35_s8, %s35_s8 }
  0x1b   :  { %p274_p11 = scmp.ne.s32.totalorder %s35_s8, %s273_s16  ;;  %p279_p13 = scmp.lt.s32.totalorder %s273_s16, %s273_s16 }
  0x1d   :  { %p280_p0 = por %p279_p13, %p278_p12 }
  0x1f   :  { %p281_p1 = pnand %p280_p0, %p274_p11 }
  0x21   :  { %284 = shalt.err (!%p281_p1)
}
  0x22   :  { %s317_s0 = smov 64   ;;  %s318_s17 = smov 4  }
  0x23   :  { %40 = dma.hbm_to_vmem [thread:$0]  %s423_s3, 256, %s35_s8, [#allocation6], %s317_s0, %s317_s0, %s318_s17  }
  0x24   :  { %307 = dma.done.wait [#allocation3], 256  }
  0x25   :  { %308 = vsyncadd [#allocation3], 4294967040 }
  0x26   :  { %309 = dma.done.wait [#allocation6], 256  }
  0x27   :  { %310 = vsyncadd [#allocation6], 4294967040  ;;  %vm52_vm0 = vcmask 261120   ;;  %v379_v0 = vld [vmem:[#allocation2] sm:$0xff]  ;;  %v381_v1 = vld [vmem:[#allocation2 + $0x8] sm:$0xff]  ;;  %v319_v15 = vmov 0.0  }
  0x28   :  { %v53_v2 = vsel %vm52_vm0, %v379_v0, 0.0  ;;  %v56_v3 = vsel %vm52_vm0, %v381_v1, 0.0  ;;  %v231_v14 = vld [vmem:[#allocation5] sm:$0xff]   ;;  %214 = vmatprep.subr.bf16.mxu0 %v319_v15  ;;  %vm320_vm1 = vmmov 0   ;;  %v232_v16 = vld [vmem:[#allocation5 + $0x8] sm:$0xff]  }
  0x29   :  { %54 = vadd.xlane.f32.xlu0 %v53_v2  ;;  %218 = vmatprep.mubr.msk.bf16.mxu0 %vm320_vm1, %v319_v15  ;;  %v205_v33 = vld [vmem:[%s421_s1] ss:$0 sm:$0xff]  ;;  %s321_s1 = smov [#allocation7]  }
  0x2a   :  { %215 = vmatpush3.bf16.msra.mxu0 %v231_v14  ;;  %v206_v39 = vld [vmem:[%s422_s2] ss:$0 sm:$0xff]  ;;  %s192_s25 = sshll.u32 %s321_s1, 4  ;;  %s193_s25 = int_to_ptr.vmem [resolvable:$true] %s192_s25 }
  0x2b   :  { %216 = vmatprep.subr.bf16.mxu0 %v319_v15  ;;  %v210_v45 = vld [vmem:[%s424_s4] ss:$0 sm:$0xff]  ;;  %s285_s2 = scalar_lea.vmem %s193_s25, 256  ;;  %p290_p3 = scmp.lt.s32.totalorder %s193_s25, %s193_s25 }
  0x2c   :  { %p286_p2 = scmp.ne.s32.totalorder %s193_s25, %s285_s2  ;;  %p291_p4 = scmp.lt.s32.totalorder %s285_s2, %s285_s2 }
  0x2d   :  { %57 = vadd.xlane.f32.xlu0 %v56_v3 }
  0x2e   :  { %217 = vmatpush3.bf16.msra.mxu0 %v232_v16  ;;  %p292_p5 = por %p291_p4, %p290_p3 }
  0x30   :  { %p293_p6 = pnand %p292_p5, %p286_p2 }
  0xb6   :  { %v55_v4 = vpop.xlane.xlu0 %54 }
  0xb7   :  { %v60_v5 = vmul.f32 0.03125, %v55_v4 }
  0xb9   :  { %v62_v6 = vsub.f32 %v379_v0, %v60_v5 }
  0xba   :  { %v58_v7 = vpop.xlane.xlu0 %57 }
  0xbb   :  { %v61_v8 = vmul.f32 0.03125, %v58_v7  ;;  %v64_v9 = vmul.f32 %v62_v6, %v62_v6 }
  0xbd   :  { %v63_v10 = vsub.f32 %v381_v1, %v61_v8  ;;  %v66_v11 = vsel %vm52_vm0, %v64_v9, 0.0 }
  0xbe   :  { %67 = vadd.xlane.f32.xlu1 %v66_v11 }
  0xbf   :  { %v65_v12 = vmul.f32 %v63_v10, %v63_v10 }
  0xc1   :  { %v69_v13 = vsel %vm52_vm0, %v65_v12, 0.0 }
  0xc2   :  { %70 = vadd.xlane.f32.xlu1 %v69_v13 }
 0x14b   :  { %v68_v17 = vpop.xlane.xlu1 %67 }
 0x14c   :  { %v73_v18 = vmul.f32 0.032258064, %v68_v17 }
 0x14e   :  { %233 = vrsqrt.f32 %v73_v18  ;;  %vm77_vm2 = vcmp.eq.f32.partialorder %v73_v18, inf  ;;  %v80_v23 = vand.u32 2147483648, %v73_v18  ;;  %vm79_vm3 = vcmp.eq.f32.partialorder %v73_v18, 0.0 }
 0x14f   :  { %v71_v19 = vpop.xlane.xlu1 %70 }
 0x150   :  { %v74_v20 = vmul.f32 0.032258064, %v71_v19 }
 0x152   :  { %235 = vrsqrt.f32 %v74_v20  ;;  %vm84_vm4 = vcmp.eq.f32.partialorder %v74_v20, inf  ;;  %v87_v29 = vand.u32 2147483648, %v74_v20  ;;  %vm86_vm5 = vcmp.eq.f32.partialorder %v74_v20, 0.0 }
 0x158   :  { %v234_v21 = vpop.eup %233 }
 0x159   :  { %v76_v22 = vmul.f32 %v234_v21, %v73_v18 }
 0x15b   :  { %v78_v24 = vsel %vm77_vm2, %v73_v18, %v76_v22 }
 0x15c   :  { %v236_v25 = vpop.eup %235  ;;  %v81_v26 = vsel %vm79_vm3, %v80_v23, %v78_v24 }
 0x15d   :  { %v89_v27 = vadd.f32 1e-06, %v81_v26  ;;  %v83_v28 = vmul.f32 %v236_v25, %v74_v20 }
 0x15f   :  { %237 = vrcp.f32 %v89_v27  ;;  %v85_v30 = vsel %vm84_vm4, %v74_v20, %v83_v28 }
 0x160   :  { %v88_v31 = vsel %vm86_vm5, %v87_v29, %v85_v30 }
 0x161   :  { %v90_v32 = vadd.f32 1e-06, %v88_v31 }
 0x163   :  { %239 = vrcp.f32 %v90_v32 }
 0x169   :  { %v238_v34 = vpop.eup %237 }
 0x16a   :  { %v100_v35 = vmul.f32 %v238_v34, %v205_v33 }
 0x16c   :  { %v102_v38 = vmul.f32 %v100_v35, %v62_v6 }
 0x16d   :  { %v240_v36 = vpop.eup %239 }
 0x16e   :  { %v101_v37 = vmul.f32 %v240_v36, %v205_v33  ;;  %v111_v41 = vadd.f32 %v206_v39, %v102_v38 }
 0x170   :  { %v103_v40 = vmul.f32 %v101_v37, %v63_v10 }
 0x172   :  { %v112_v42 = vadd.f32 %v206_v39, %v103_v40 }
 0x174   :  { %v113_v43 = vpack.c.bf16 %v112_v42, %v111_v41 }
 0x176   :  { %219 = vmatmul.mubr.msk.bf16.vlgmr.msra.gmra.mrb[0].mxu0 %vm52_vm0, %v113_v43 }
 0x249   :  { %v167_v44 = vpop.f32.mrb[0].mxu0 }
 0x24a   :  { %v174_v46 = vadd.f32 %v167_v44, %v379_v0  ;;  %v220_v47 = vpop.f32.mrb[1].mxu0 }
 0x24b   :  { %v170_v48 = vpop.f32.mrb[2].mxu0 }
 0x24c   :  { %v183_v49 = vadd.f32 %v210_v45, %v174_v46  ;;  %v175_v50 = vadd.f32 %v170_v48, %v381_v1  ;;  %v221_v51 = vpop.f32.mrb[3].mxu0 }
 0x24e   :  { %185 = vst.msk [vmem:[#allocation7] sm:$0xff] %vm52_vm0, %v183_v49  ;;  %v184_v52 = vadd.f32 %v210_v45, %v175_v50 }
 0x250   :  { %186 = vst.msk [vmem:[#allocation7 + $0x8] sm:$0xff] %vm52_vm0, %v184_v52 }
 0x251   :  { %296 = shalt.err (!%p293_p6)
}
 0x252   :  { %s297_s27 = scalar_lea.hbm %s425_s5, 256 }
 0x253   :  { %p298_p7 = scmp.ne.s32.totalorder %s425_s5, %s297_s27  ;;  %p301_p8 = scmp.lt.u32.totalorder %s297_s27, %s425_s5 }
 0x255   :  { %p303_p9 = pnand %p301_p8, %p298_p7 }
 0x257   :  { %306 = shalt.err (!%p303_p9)
}
 0x258   :  { %198 = dma.vmem_to_hbm [thread:$0]  %s193_s25, 256, %s425_s5, [#allocation4], %s314_s28, %s314_s28, %s315_s29  }
 0x259   :  { %311 = dma.done.wait [#allocation4], 256  }
 0x25a   :  { %312 = vsyncadd [#allocation4], 4294967040 }
 0x25b   :  { %202 = vsyncpa [#allocation3], 1 }
 0x25c   :  { %203 = vsyncpa [#allocation6], 1 }
 0x25d   :  { %204 = vsyncpa [#allocation4], 1 }

</bundles_post_ra>
